<compile_context>
chip_gen: v7x
topology: tpu7x:2x2x1
jax: 0.10.0
libtpu: 0.0.40
codegen_flags: <defaults>
</compile_context>

<pallas_src>
import functools
import math

import jax
import jax.numpy as jnp
from jax.experimental import pallas as pl
from jax.experimental.pallas import tpu as pltpu

BN_EPS = 1e-5


def _round_up(x, m):
    return (x + m - 1) // m * m


# --------------------------- pass A: support = x @ W ------------------------
def support_kernel(x_ref, w_ref, o_ref):
    # f32 MXU matmul, cast to bf16 for the HBM-bound second matmul.
    o_ref[...] = jnp.dot(x_ref[...], w_ref[...],
                         preferred_element_type=jnp.float32).astype(o_ref.dtype)


# ----------------- pass B: out = adj @ support  (+ BN partials) -------------
def adj_matmul_kernel(adj_ref, sup_ref, o_ref, sum_ref, ssq_ref, *,
                      tk, sup_resident):
    k = pl.program_id(1)
    nk = pl.num_programs(1)

    @pl.when(k == 0)
    def _init():
        o_ref[...] = jnp.zeros_like(o_ref)

    if sup_resident:
        # Whole bf16 support matrix is resident in VMEM; slice the K-slab.
        row0 = pl.multiple_of(k * tk, tk)
        sup = sup_ref[pl.ds(row0, tk), :]
    else:
        sup = sup_ref[...]

    # bf16 x bf16 -> f32 accumulation straight into the streamed output tile.
    o_ref[...] += jnp.dot(adj_ref[...], sup, preferred_element_type=jnp.float32)

    @pl.when(k == nk - 1)
    def _stats():
        # Per-row-tile BN partial statistics (hidden under the MXU/DMA loop).
        # Padded rows of out are all-zero, so they contribute nothing.
        tile = o_ref[...]                                   # (tm, f_pad) f32
        f_pad = tile.shape[-1]
        s = jnp.sum(tile, axis=0, keepdims=True)            # (1, f_pad)
        q = jnp.sum(tile * tile, axis=0, keepdims=True)
        row_ids = jax.lax.broadcasted_iota(jnp.int32, (8, f_pad), 0)
        first = row_ids == 0
        sum_ref[...] = jnp.where(first, s, 0.0)
        ssq_ref[...] = jnp.where(first, q, 0.0)


# --------------------------- pass C: BN apply + tanh ------------------------
def bn_tanh_kernel(x_ref, scale_ref, shift_ref, o_ref):
    o_ref[...] = jnp.tanh(x_ref[...] * scale_ref[...] + shift_ref[...])


def graph_convolution(adj, x, weight, gamma, beta, *, tm=512, tk=1024):
    n = adj.shape[0]
    f_in, f_out = weight.shape
    f32, bf16 = jnp.float32, jnp.bfloat16

    # Lane-dense (128-multiple) feature axes.
    f_pad = _round_up(f_out, 128)
    f_in_pad = _round_up(f_in, 128)

    # Tile sizes, clamped for small graphs (rows 8-aligned, K 128-aligned).
    tm = min(tm, _round_up(n, 8))
    tk = min(tk, _round_up(n, 128))
    n_m = _round_up(n, tm)
    n_k = _round_up(n, tk)
    ni, nk = n_m // tm, n_k // tk

    # Per-generation VMEM budget (128 MiB v5e/v6e, 64 MiB v7x).
    try:
        vmem_cap = int(pltpu.get_tpu_info().vmem_capacity_bytes)
    except Exception:  # conservative fallback
        vmem_cap = 64 << 20

    # Pad adj with the bf16 cast fused into the same pass (skip pad if aligned).
    if (n_m, n_k) == (n, n):
        adj_p = adj.astype(bf16)
    else:
        adj_p = jnp.zeros((n_m, n_k), bf16).at[:n, :n].set(adj.astype(bf16))
    x_p = jnp.zeros((n_k, f_in_pad), f32).at[:n, :f_in].set(x.astype(f32))
    w_p = jnp.zeros((f_in_pad, f_pad), f32).at[:f_in, :f_out].set(
        weight.astype(f32))
    # Padded feature columns carry gamma=beta=0 so they stay exactly zero.
    gamma_p = jnp.zeros((1, f_pad), f32).at[:, :f_out].set(
        gamma.reshape(1, f_out).astype(f32))
    beta_p = jnp.zeros((1, f_pad), f32).at[:, :f_out].set(
        beta.reshape(1, f_out).astype(f32))

    # ---- pass A: support = x @ W (computed once, bf16 output) --------------
    support = pl.pallas_call(
        support_kernel,
        out_shape=jax.ShapeDtypeStruct((n_k, f_pad), bf16),
        grid=(nk,),
        in_specs=[pl.BlockSpec((tk, f_in_pad), lambda i: (i, 0)),
                  pl.BlockSpec((f_in_pad, f_pad), lambda i: (0, 0))],
        out_specs=pl.BlockSpec((tk, f_pad), lambda i: (i, 0)),
        compiler_params=pltpu.CompilerParams(dimension_semantics=("parallel",)),
        cost_estimate=pl.CostEstimate(
            flops=2 * n * f_in * f_out, transcendentals=0,
            bytes_accessed=4 * (n_k * f_in_pad + f_in_pad * f_pad)
            + 2 * n_k * f_pad),
    )(x_p, w_p)

    # ---- pass B: out = adj @ support, row-streamed + BN partials -----------
    sup_bytes = n_k * f_pad * 2
    sup_resident = sup_bytes <= min(vmem_cap // 3, 32 << 20)
    if sup_resident:
        sup_spec = pl.BlockSpec((n_k, f_pad), lambda i, k: (0, 0))
    else:
        sup_spec = pl.BlockSpec((tk, f_pad), lambda i, k: (k, 0))

    vmem_need_b = (2 * tm * tk * 2                                 # adj (bf16, dbl buf)
                   + (sup_bytes if sup_resident else 2 * tk * f_pad * 2)
                   + 2 * tm * f_pad * 4                            # out tiles (f32)
                   + 4 * 8 * f_pad * 4)                            # stats tiles
    vmem_limit_b = int(min(max(vmem_need_b + (8 << 20), 16 << 20),
                           int(vmem_cap * 0.85)))

    kernel_b = functools.partial(adj_matmul_kernel, tk=tk,
                                 sup_resident=sup_resident)
    out_p, psum, pssq = pl.pallas_call(
        kernel_b,
        out_shape=(jax.ShapeDtypeStruct((n_m, f_pad), f32),
                   jax.ShapeDtypeStruct((ni * 8, f_pad), f32),
                   jax.ShapeDtypeStruct((ni * 8, f_pad), f32)),
        grid=(ni, nk),
        in_specs=[pl.BlockSpec((tm, tk), lambda i, k: (i, k)),   # adj (streamed)
                  sup_spec],                                     # support
        out_specs=(pl.BlockSpec((tm, f_pad), lambda i, k: (i, 0)),
                   pl.BlockSpec((8, f_pad), lambda i, k: (i, 0)),
                   pl.BlockSpec((8, f_pad), lambda i, k: (i, 0))),
        compiler_params=pltpu.CompilerParams(
            # Row tiles are fully independent (own out + stats blocks), so the
            # row axis shards across TensorCores; K is the contraction axis.
            dimension_semantics=("parallel", "arbitrary"),
            vmem_limit_bytes=vmem_limit_b),
        cost_estimate=pl.CostEstimate(
            flops=2 * n * n * f_out, transcendentals=0,
            bytes_accessed=2 * n_m * n_k + 2 * n_k * f_pad + 4 * n_m * f_pad),
    )(adj_p, support)

    # ---- BN statistics (training-mode / biased variance over the real N) ---
    total_sum = jnp.sum(psum, axis=0, keepdims=True)
    total_ssq = jnp.sum(pssq, axis=0, keepdims=True)
    mean = total_sum / n
    var = jnp.maximum(total_ssq / n - mean * mean, 0.0)
    inv_std = jax.lax.rsqrt(var + BN_EPS)
    scale = gamma_p * inv_std
    shift = beta_p - mean * scale

    # ---- pass C: out = tanh(out * scale + shift), row-tiled ----------------
    out_f = pl.pallas_call(
        bn_tanh_kernel,
        out_shape=jax.ShapeDtypeStruct((n_m, f_pad), f32),
        grid=(ni,),
        in_specs=[pl.BlockSpec((tm, f_pad), lambda i: (i, 0)),
                  pl.BlockSpec((1, f_pad), lambda i: (0, 0)),
                  pl.BlockSpec((1, f_pad), lambda i: (0, 0))],
        out_specs=pl.BlockSpec((tm, f_pad), lambda i: (i, 0)),
        compiler_params=pltpu.CompilerParams(dimension_semantics=("parallel",)),
        cost_estimate=pl.CostEstimate(
            flops=2 * n_m * f_pad, transcendentals=n_m * f_pad,
            bytes_accessed=8 * n_m * f_pad),
    )(out_p, scale, shift)

    return out_f[:n, :f_out]


def reference(adj, x, weight, gamma, beta):
    support = x @ weight
    out = adj @ support
    mean = jnp.mean(out, axis=0, keepdims=True)
    var = jnp.mean((out - mean) ** 2, axis=0, keepdims=True)
    normed = (out - mean) * jax.lax.rsqrt(var + BN_EPS) * gamma + beta
    return jnp.tanh(normed)


if __name__ == "__main__":
    # Small, module-consistent shapes: N nodes, F_in -> F_out features.
    N, F_IN, F_OUT = 64, 32, 32

    key = jax.random.PRNGKey(0)
    k_adj, k_x, k_w = jax.random.split(key, 3)

    # Parameter init matching reset_parameters(): weight ~ U(-stdv, stdv),
    # stdv = 1/sqrt(out_features); bias=False (module default).
    stdv = 1.0 / math.sqrt(F_OUT)
    weight = jax.random.uniform(
        k_w, (F_IN, F_OUT), dtype=jnp.float32, minval=-stdv, maxval=stdv)
    # BatchNorm1d affine params at their defaults.
    gamma = jnp.ones((1, F_OUT), jnp.float32)
    beta = jnp.zeros((1, F_OUT), jnp.float32)

    # Example inputs: a row-normalized dense adjacency and node features.
    adj_raw = (jax.random.uniform(k_adj, (N, N), dtype=jnp.float32) > 0.7
               ).astype(jnp.float32) + jnp.eye(N, dtype=jnp.float32)
    adj = adj_raw / jnp.sum(adj_raw, axis=1, keepdims=True)
    x = jax.random.normal(k_x, (N, F_IN), dtype=jnp.float32)

    out = graph_convolution(adj, x, weight, gamma, beta)
    jax.block_until_ready(out)

    ref = reference(adj, x, weight, gamma, beta)
    assert out.shape == (N, F_OUT)
    # adj / support stream in bf16 (f32 MXU accumulation), so compare against
    # the pure-f32 reference with a bf16-input-rounding tolerance.
    assert jnp.allclose(out, ref, atol=3e-2, rtol=3e-2), "mismatch vs reference"

    print("KERNEL_OK")
</pallas_src>

<mosaic_0001>
module attributes {stable_mosaic.version = 11 : i64} {
  func.func @support_kernel(%arg0: i32, %arg1: memref<128x128xf32, #tpu.memory_space<vmem>>, %arg2: memref<128x128xf32, #tpu.memory_space<vmem>>, %arg3: memref<128x128xbf16, #tpu.memory_space<vmem>>) attributes {dimension_semantics = [#tpu.dimension_semantics<parallel>], iteration_bounds = array<i64: 1>, scalar_prefetch = 0 : i64, scratch_operands = 0 : i64, tpu.core_type = #tpu.core_type<tc>, window_params = [{transform_indices = @transform_0, window_bounds = array<i64: 128, 128>}, {pipeline_mode = #tpu.pipeline_mode<synchronous>, transform_indices = @transform_1, window_bounds = array<i64: 128, 128>}, {transform_indices = @transform_2, window_bounds = array<i64: 128, 128>}]} {
    %c0 = arith.constant 0 : index
    %c0_0 = arith.constant 0 : index
    %0 = vector.load %arg1[%c0, %c0_0] : memref<128x128xf32, #tpu.memory_space<vmem>>, vector<128x128xf32>
    %c0_1 = arith.constant 0 : index
    %c0_2 = arith.constant 0 : index
    %1 = vector.load %arg2[%c0_1, %c0_2] : memref<128x128xf32, #tpu.memory_space<vmem>>, vector<128x128xf32>
    %cst = arith.constant dense<0.000000e+00> : vector<128x128xf32>
    %2 = tpu.matmul %0, %1, %cst {dimension_numbers = #tpu.dot_dimension_numbers<[1], [0], [0], [1], [0, 0, 1, 1], [], []>} : vector<128x128xf32>, vector<128x128xf32>, vector<128x128xf32> -> vector<128x128xf32>
    %3 = arith.truncf %2 : vector<128x128xf32> to vector<128x128xbf16>
    %c0_3 = arith.constant 0 : index
    %c0_4 = arith.constant 0 : index
    %4 = vector.load %arg3[%c0_3, %c0_4] : memref<128x128xbf16, #tpu.memory_space<vmem>>, vector<128x128xbf16>
    tpu.vector_store %arg3[%c0_3, %c0_4], %3 {strides = array<i32>} : memref<128x128xbf16, #tpu.memory_space<vmem>>, vector<128x128xbf16>,
    return
  }
  func.func @transform_0(%arg0: i32) -> (i32, i32) {
    %c0_i32 = arith.constant 0 : i32
    %c0_i32_0 = arith.constant 0 : i32
    return %arg0, %c0_i32 : i32, i32
  }
  func.func @transform_1(%arg0: i32) -> (i32, i32) {
    %c0_i32 = arith.constant 0 : i32
    %c0_i32_0 = arith.constant 0 : i32
    %c0_i32_1 = arith.constant 0 : i32
    return %c0_i32, %c0_i32_0 : i32, i32
  }
  func.func @transform_2(%arg0: i32) -> (i32, i32) {
    %c0_i32 = arith.constant 0 : i32
    %c0_i32_0 = arith.constant 0 : i32
    return %arg0, %c0_i32 : i32, i32
  }
}

</mosaic_0001>

<bundles_post_ra>
// kernel: tpu_custom_call.1
= control target key start
LH: loop header
LB: loop body
LE: loop exit
PB: predicated region body
PF: predicated region fallthrough
CT: control target
= control target key end

     0   :  { %7 = vsyncpa [#allocation3], 0  ;;  %s667_s0 = inlined_call_operand.hbm [shape: f32[128,128], index: 0, kind: input, shape index: {}]   ;;  %s668_s1 = inlined_call_operand.hbm [shape: f32[128,128], index: 1, kind: input, shape index: {}]   ;;  %s669_s2 = inlined_call_operand.hbm [shape: bf16[128,128], index: 2, kind: output, shape index: {}]  }
   0x1   :  { %8 = vsyncpa [#allocation6], 0 }
   0x2   :  { %9 = vsyncpa [#allocation4], 0  ;;  %s609_s9 = smov [#allocation2]   ;;  %s537_s13 = scalar_lea.hbm %s667_s0, 2048 }
   0x3   :  { %s15_s10 = sshll.u32 %s609_s9, 4  ;;  %p538_p0 = scmp.ne.s32.totalorder %s667_s0, %s537_s13  ;;  %s16_s10 = int_to_ptr.vmem [resolvable:$true] %s15_s10 }
   0x4   :  { %p541_p1 = scmp.lt.u32.totalorder %s537_s13, %s667_s0 }
   0x6   :  { %p543_p2 = pnand %p541_p1, %p538_p0 }
   0x8   :  { %546 = shalt.err (!%p543_p2)
}
   0x9   :  { %s547_s18 = scalar_lea.vmem %s16_s10, 2048  ;;  %p552_p4 = scmp.lt.s32.totalorder %s16_s10, %s16_s10 }
   0xa   :  { %p548_p3 = scmp.ne.s32.totalorder %s16_s10, %s547_s18  ;;  %p553_p5 = scmp.lt.s32.totalorder %s547_s18, %s547_s18 }
   0xc   :  { %p554_p6 = por %p553_p5, %p552_p4 }
   0xe   :  { %p555_p7 = pnand %p554_p6, %p548_p3 }
  0x10   :  { %558 = shalt.err (!%p555_p7)
}
  0x11   :  { %s610_s19 = smov 128   ;;  %s611_s20 = smov 8  }
  0x12   :  { %21 = dma.hbm_to_vmem [thread:$0]  %s667_s0, 2048, %s16_s10, [#allocation3], %s610_s19, %s610_s19, %s611_s20  }
  0x13   :  { %s612_s23 = smov [#allocation5]   ;;  %s559_s27 = scalar_lea.hbm %s668_s1, 2048 }
  0x14   :  { %s27_s24 = sshll.u32 %s612_s23, 4  ;;  %p560_p8 = scmp.ne.s32.totalorder %s668_s1, %s559_s27  ;;  %s28_s24 = int_to_ptr.vmem [resolvable:$true] %s27_s24 }
  0x15   :  { %p563_p9 = scmp.lt.u32.totalorder %s559_s27, %s668_s1 }
  0x17   :  { %p565_p10 = pnand %p563_p9, %p560_p8 }
  0x19   :  { %568 = shalt.err (!%p565_p10)
}
  0x1a   :  { %s569_s4 = scalar_lea.vmem %s28_s24, 2048  ;;  %p574_p12 = scmp.lt.s32.totalorder %s28_s24, %s28_s24 }
  0x1b   :  { %p570_p11 = scmp.ne.s32.totalorder %s28_s24, %s569_s4  ;;  %p575_p13 = scmp.lt.s32.totalorder %s569_s4, %s569_s4 }
  0x1d   :  { %p576_p0 = por %p575_p13, %p574_p12 }
  0x1f   :  { %p577_p1 = pnand %p576_p0, %p570_p11 }
  0x21   :  { %580 = shalt.err (!%p577_p1)
}
  0x22   :  { %33 = dma.hbm_to_vmem [thread:$0]  %s668_s1, 2048, %s28_s24, [#allocation6], %s610_s19, %s610_s19, %s611_s20  }
  0x23   :  { %603 = dma.done.wait [#allocation3], 2048  }
  0x24   :  { %604 = vsyncadd [#allocation3], 4294965248 }
  0x25   :  { %605 = dma.done.wait [#allocation6], 2048  }
  0x26   :  { %606 = vsyncadd [#allocation6], 4294965248  ;;  %v56_v0 = vld [vmem:[#allocation5] sm:$0xff]  ;;  %v57_v1 = vld [vmem:[#allocation5 + $0x8] sm:$0xff]  ;;  %s613_s1 = smov [#allocation7]  }
  0x27   :  { %v58_v2 = vld [vmem:[#allocation5 + $0x10] sm:$0xff]  ;;  %v482_v3 = vpack.c.bf16 %v57_v1, %v56_v0  ;;  %v59_v4 = vld [vmem:[#allocation5 + $0x18] sm:$0xff]  ;;  %v60_v6 = vld [vmem:[#allocation5 + $0x20] sm:$0xff]  ;;  %s302_s6 = sshll.u32 %s613_s1, 4  ;;  %s303_s6 = int_to_ptr.vmem [resolvable:$true] %s302_s6 }
  0x28   :  { %v486_v5 = vpack.c.bf16 %v59_v4, %v58_v2  ;;  %v61_v7 = vld [vmem:[#allocation5 + $0x28] sm:$0xff]  ;;  %v40_v9 = vld [vmem:[#allocation2] sm:$0xff]  ;;  %v62_v11 = vld [vmem:[#allocation5 + $0x30] sm:$0xff]  ;;  %s581_s7 = scalar_lea.vmem %s303_s6, 1024  ;;  %p586_p3 = scmp.lt.s32.totalorder %s303_s6, %s303_s6 }
  0x29   :  { %483 = vmatprep.subr.bf16.mxu0 %v482_v3  ;;  %514 = vmatprep.subr.bf16.mxu1 %v482_v3  ;;  %v490_v8 = vpack.c.bf16 %v61_v7, %v60_v6  ;;  %v48_v10 = vld [vmem:[#allocation2 + $0x40] sm:$0xff]  ;;  %v63_v12 = vld [vmem:[#allocation5 + $0x38] sm:$0xff]  ;;  %v65_v15 = vld [vmem:[#allocation5 + $0x48] sm:$0xff]  ;;  %p582_p2 = scmp.ne.s32.totalorder %s303_s6, %s581_s7  ;;  %p587_p4 = scmp.lt.s32.totalorder %s581_s7, %s581_s7 }
  0x2a   :  { %485 = vmatpush3.bf16.msra.mxu0 %v482_v3  ;;  %522 = vmatpush3.bf16.msra.mxu1 %v482_v3  ;;  %v494_v13 = vpack.c.bf16 %v63_v12, %v62_v11  ;;  %v64_v14 = vld [vmem:[#allocation5 + $0x40] sm:$0xff]  ;;  %v66_v17 = vld [vmem:[#allocation5 + $0x50] sm:$0xff]  ;;  %v67_v18 = vld [vmem:[#allocation5 + $0x58] sm:$0xff] }
  0x2b   :  { %487 = vmatprep.subr.bf16.mxu0 %v486_v5  ;;  %515 = vmatprep.subr.bf16.mxu1 %v486_v5  ;;  %v498_v16 = vpack.c.bf16 %v65_v15, %v64_v14  ;;  %v502_v19 = vpack.c.bf16 %v67_v18, %v66_v17  ;;  %v68_v20 = vld [vmem:[#allocation5 + $0x60] sm:$0xff]  ;;  %v69_v21 = vld [vmem:[#allocation5 + $0x68] sm:$0xff]  ;;  %v70_v23 = vld [vmem:[#allocation5 + $0x70] sm:$0xff]  ;;  %p588_p5 = por %p587_p4, %p586_p3 }
  0x2c   :  { %458 = vmatprep.mubr.f32.mxu0 %v40_v9  ;;  %470 = vmatprep.mubr.f32.mxu1 %v48_v10  ;;  %v506_v22 = vpack.c.bf16 %v69_v21, %v68_v20  ;;  %v71_v24 = vld [vmem:[#allocation5 + $0x78] sm:$0xff]  ;;  %v41_v26 = vld [vmem:[#allocation2 + $0x8] sm:$0xff]  ;;  %v42_v28 = vld [vmem:[#allocation2 + $0x10] sm:$0xff] }
  0x2d   :  { %v510_v25 = vpack.c.bf16 %v71_v24, %v70_v23  ;;  %v49_v27 = vld [vmem:[#allocation2 + $0x48] sm:$0xff]  ;;  %v50_v29 = vld [vmem:[#allocation2 + $0x50] sm:$0xff]  ;;  %v43_v30 = vld [vmem:[#allocation2 + $0x18] sm:$0xff]  ;;  %p589_p6 = pnand %p588_p5, %p582_p2 }
  0x2e   :  { %489 = vmatpush3.bf16.msra.mxu0 %v486_v5  ;;  %523 = vmatpush3.bf16.msra.mxu1 %v486_v5  ;;  %v51_v31 = vld [vmem:[#allocation2 + $0x58] sm:$0xff]  ;;  %v44_v32 = vld [vmem:[#allocation2 + $0x20] sm:$0xff]  ;;  %v45_v34 = vld [vmem:[#allocation2 + $0x28] sm:$0xff] }
  0x2f   :  { %491 = vmatprep.subr.bf16.mxu0 %v490_v8  ;;  %516 = vmatprep.subr.bf16.mxu1 %v490_v8  ;;  %v52_v33 = vld [vmem:[#allocation2 + $0x60] sm:$0xff]  ;;  %v53_v35 = vld [vmem:[#allocation2 + $0x68] sm:$0xff]  ;;  %v46_v36 = vld [vmem:[#allocation2 + $0x30] sm:$0xff] }
  0x30   :  { %v54_v37 = vld [vmem:[#allocation2 + $0x70] sm:$0xff]  ;;  %v47_v38 = vld [vmem:[#allocation2 + $0x38] sm:$0xff] }
  0x31   :  { %v55_v39 = vld [vmem:[#allocation2 + $0x78] sm:$0xff] }
  0x32   :  { %493 = vmatpush3.bf16.msra.mxu0 %v490_v8  ;;  %524 = vmatpush3.bf16.msra.mxu1 %v490_v8 }
  0x33   :  { %495 = vmatprep.subr.bf16.mxu0 %v494_v13  ;;  %517 = vmatprep.subr.bf16.mxu1 %v494_v13 }
  0x36   :  { %497 = vmatpush3.bf16.msra.mxu0 %v494_v13  ;;  %525 = vmatpush3.bf16.msra.mxu1 %v494_v13 }
  0x37   :  { %499 = vmatprep.subr.bf16.mxu0 %v498_v16  ;;  %518 = vmatprep.subr.bf16.mxu1 %v498_v16 }
  0x3a   :  { %501 = vmatpush3.bf16.msra.mxu0 %v498_v16  ;;  %526 = vmatpush3.bf16.msra.mxu1 %v498_v16 }
  0x3b   :  { %503 = vmatprep.subr.bf16.mxu0 %v502_v19  ;;  %519 = vmatprep.subr.bf16.mxu1 %v502_v19 }
  0x3e   :  { %505 = vmatpush3.bf16.msra.mxu0 %v502_v19  ;;  %527 = vmatpush3.bf16.msra.mxu1 %v502_v19 }
  0x3f   :  { %507 = vmatprep.subr.bf16.mxu0 %v506_v22  ;;  %520 = vmatprep.subr.bf16.mxu1 %v506_v22 }
  0x42   :  { %509 = vmatpush3.bf16.msra.mxu0 %v506_v22  ;;  %528 = vmatpush3.bf16.msra.mxu1 %v506_v22 }
  0x43   :  { %511 = vmatprep.subr.bf16.mxu0 %v510_v25  ;;  %521 = vmatprep.subr.bf16.mxu1 %v510_v25 }
  0x46   :  { %513 = vmatpush3.bf16.msra.mxu0 %v510_v25  ;;  %529 = vmatpush3.bf16.msra.mxu1 %v510_v25 }
  0x49   :  { %459 = vmatmul.mubr.f32.vlgmr.msra.gmra.mrb[0].mxu0 %v41_v26  ;;  %471 = vmatmul.mubr.f32.vlgmr.msra.gmra.mrb[0].mxu1 %v49_v27 }
  0x4a   :  { %461 = vmatprep.mubr.f32.mxu0 %v42_v28  ;;  %473 = vmatprep.mubr.f32.mxu1 %v50_v29 }
  0x4d   :  { %462 = vmatmul.mubr.f32.gmra.mrb[2].mxu0 %v43_v30  ;;  %474 = vmatmul.mubr.f32.gmra.mrb[2].mxu1 %v51_v31 }
  0x4e   :  { %464 = vmatprep.mubr.f32.mxu0 %v44_v32  ;;  %476 = vmatprep.mubr.f32.mxu1 %v52_v33 }
  0x51   :  { %465 = vmatmul.mubr.f32.gmra.mrb[4].mxu0 %v45_v34  ;;  %477 = vmatmul.mubr.f32.gmra.mrb[4].mxu1 %v53_v35 }
  0x52   :  { %467 = vmatprep.mubr.f32.mxu0 %v46_v36  ;;  %479 = vmatprep.mubr.f32.mxu1 %v54_v37 }
  0x55   :  { %468 = vmatmul.mubr.f32.gmra.mrb[6].mxu0 %v47_v38  ;;  %480 = vmatmul.mubr.f32.gmra.mrb[6].mxu1 %v55_v39 }
 0x11c   :  { %v460_v40 = vpop.f32.mrb[0].mxu0  ;;  %v472_v41 = vpop.f32.mrb[0].mxu1 }
 0x11d   :  { %v138_v42 = vpop.f32.mrb[1].mxu0  ;;  %v178_v43 = vpop.f32.mrb[1].mxu1 }
 0x11e   :  { %v350_v44 = vpack.c.bf16 %v460_v40, %v138_v42  ;;  %v370_v45 = vpack.c.bf16 %v472_v41, %v178_v43 }
 0x120   :  { %351 = vst [vmem:[#allocation7] sm:$0xff] %v350_v44   ;;  %390 = vst [vmem:[#allocation7 + $0x20] sm:$0xff] %v370_v45   ;;  %v463_v46 = vpop.f32.mrb[2].mxu0  ;;  %v475_v47 = vpop.f32.mrb[2].mxu1 }
 0x121   :  { %v148_v48 = vpop.f32.mrb[3].mxu0  ;;  %v188_v49 = vpop.f32.mrb[3].mxu1 }
 0x122   :  { %v355_v50 = vpack.c.bf16 %v463_v46, %v148_v48  ;;  %v375_v51 = vpack.c.bf16 %v475_v47, %v188_v49 }
 0x124   :  { %387 = vst [vmem:[#allocation7 + $0x8] sm:$0xff] %v355_v50   ;;  %391 = vst [vmem:[#allocation7 + $0x28] sm:$0xff] %v375_v51   ;;  %v466_v52 = vpop.f32.mrb[4].mxu0  ;;  %v478_v53 = vpop.f32.mrb[4].mxu1 }
 0x125   :  { %v158_v54 = vpop.f32.mrb[5].mxu0  ;;  %v198_v55 = vpop.f32.mrb[5].mxu1 }
 0x126   :  { %v360_v56 = vpack.c.bf16 %v466_v52, %v158_v54  ;;  %v380_v57 = vpack.c.bf16 %v478_v53, %v198_v55 }
 0x128   :  { %388 = vst [vmem:[#allocation7 + $0x10] sm:$0xff] %v360_v56   ;;  %392 = vst [vmem:[#allocation7 + $0x30] sm:$0xff] %v380_v57   ;;  %v469_v58 = vpop.f32.mrb[6].mxu0  ;;  %v481_v59 = vpop.f32.mrb[6].mxu1 }
 0x129   :  { %v168_v60 = vpop.f32.mrb[7].mxu0  ;;  %v208_v61 = vpop.f32.mrb[7].mxu1 }
 0x12a   :  { %v365_v62 = vpack.c.bf16 %v469_v58, %v168_v60  ;;  %v385_v63 = vpack.c.bf16 %v481_v59, %v208_v61 }
 0x12c   :  { %389 = vst [vmem:[#allocation7 + $0x18] sm:$0xff] %v365_v62   ;;  %393 = vst [vmem:[#allocation7 + $0x38] sm:$0xff] %v385_v63  }
 0x12d   :  { %592 = shalt.err (!%p589_p6)
}
 0x12e   :  { %s593_s10 = scalar_lea.hbm %s669_s2, 1024 }
 0x12f   :  { %p594_p7 = scmp.ne.s32.totalorder %s669_s2, %s593_s10  ;;  %p597_p8 = scmp.lt.u32.totalorder %s593_s10, %s669_s2 }
 0x131   :  { %p599_p9 = pnand %p597_p8, %p594_p7 }
 0x133   :  { %602 = shalt.err (!%p599_p9)
}
 0x134   :  { %s614_s15 = smov 64   ;;  %s615_s16 = smov 4  }
 0x135   :  { %308 = dma.vmem_to_hbm [thread:$0]  %s303_s6, 1024, %s669_s2, [#allocation4], %s614_s15, %s614_s15, %s615_s16  }
 0x136   :  { %607 = dma.done.wait [#allocation4], 1024  }
 0x137   :  { %608 = vsyncadd [#allocation4], 4294966272 }
 0x138   :  { %312 = vsyncpa [#allocation3], 1 }
 0x139   :  { %313 = vsyncpa [#allocation6], 1 }
 0x13a   :  { %314 = vsyncpa [#allocation4], 1 }

</bundles_post_ra>
